<compile_context>
chip_gen: v7x
topology: tpu7x:2x2x1
jax: 0.10.0
libtpu: 0.0.40
codegen_flags: <defaults>
</compile_context>

<pallas_src>
import jax
import jax.numpy as jnp
from jax.experimental import pallas as pl
from jax.experimental.pallas import tpu as pltpu

IN_DIM = 50      # nn.Linear in_features
OUT_DIM = 10     # nn.Linear out_features


def _linear_add_kernel(x_ref, w_ref, bo_ref, o_ref):
    # x: [B, IN], w: [IN, OUT] (pre-transposed), bo: [1, OUT] (bias + other)
    # o: [B, OUT]
    acc = jnp.dot(
        x_ref[...],
        w_ref[...],
        preferred_element_type=jnp.float32,
        precision=jax.lax.Precision.HIGHEST,
    )
    o_ref[...] = acc + bo_ref[...]


def prepare_params(weight, bias, other):
    """One-time repack of PyTorch-layout params into MXU-friendly layout.

    weight: [OUT, IN] (PyTorch convention) -> [IN, OUT] (pre-transposed).
    bias [1, OUT] and the constant residual `other` [1, OUT] are folded into
    a single pre-summed [1, OUT] array (both are forward-pass constants in
    the original module).
    """
    w_t = jnp.asarray(weight, jnp.float32).T            # [IN, OUT]
    bo = jnp.asarray(bias, jnp.float32) + jnp.asarray(other, jnp.float32)
    return w_t, bo.reshape(1, OUT_DIM)


@jax.jit
def linear_add(x1, w_t, bo):
    """v2 = x1 @ W.T + bias + other, computed in one fused Pallas kernel."""
    B = x1.shape[0]
    return pl.pallas_call(
        _linear_add_kernel,
        out_shape=jax.ShapeDtypeStruct((B, OUT_DIM), jnp.float32),
        # No grid: single invocation, whole arrays resident in VMEM.
        in_specs=[
            pl.BlockSpec(memory_space=pltpu.MemorySpace.VMEM),  # x1
            pl.BlockSpec(memory_space=pltpu.MemorySpace.VMEM),  # w_t
            pl.BlockSpec(memory_space=pltpu.MemorySpace.VMEM),  # bias+other
        ],
        out_specs=pl.BlockSpec(memory_space=pltpu.MemorySpace.VMEM),
    )(x1, w_t, bo)


if __name__ == "__main__":
    key = jax.random.PRNGKey(0)
    k_x, k_w, k_b, k_o = jax.random.split(key, 4)

    # Deterministic synthetic parameters (shapes from nn.Linear(50, 10)).
    x1 = jax.random.normal(k_x, (1, IN_DIM), dtype=jnp.float32)
    weight = jax.random.normal(k_w, (OUT_DIM, IN_DIM), dtype=jnp.float32) * 0.1
    bias = jax.random.normal(k_b, (1, OUT_DIM), dtype=jnp.float32) * 0.1
    other = jax.random.normal(k_o, (1, OUT_DIM), dtype=jnp.float32)

    # One-time param repack (transpose + bias/other fold), then run the kernel.
    w_t, bo = prepare_params(weight, bias, other)
    out = linear_add(x1, w_t, bo)
    jax.block_until_ready(out)

    # Pure-JAX reference check against the original (unfolded) params.
    ref = x1 @ weight.T + bias + other
    assert out.shape == (1, OUT_DIM)
    assert jnp.allclose(out, ref, atol=1e-5, rtol=1e-5)

    print("KERNEL_OK")
</pallas_src>

<mosaic_0001>
module attributes {stable_mosaic.version = 11 : i64} {
  func.func @_linear_add_kernel(%arg0: memref<1x50xf32, #tpu.memory_space<vmem>>, %arg1: memref<50x10xf32, #tpu.memory_space<vmem>>, %arg2: memref<1x10xf32, #tpu.memory_space<vmem>>, %arg3: memref<1x10xf32, #tpu.memory_space<vmem>>) attributes {dimension_semantics = [], scalar_prefetch = 0 : i64, scratch_operands = 0 : i64, tpu.core_type = #tpu.core_type<tc>} {
    %c0 = arith.constant 0 : index
    %c0_0 = arith.constant 0 : index
    %0 = vector.load %arg0[%c0, %c0_0] : memref<1x50xf32, #tpu.memory_space<vmem>>, vector<1x50xf32>
    %c0_1 = arith.constant 0 : index
    %c0_2 = arith.constant 0 : index
    %1 = vector.load %arg1[%c0_1, %c0_2] : memref<50x10xf32, #tpu.memory_space<vmem>>, vector<50x10xf32>
    %cst = arith.constant dense<0.000000e+00> : vector<1x10xf32>
    %2 = tpu.matmul %0, %1, %cst {dimension_numbers = #tpu.dot_dimension_numbers<[1], [0], [0], [1], [0, 0, 1, 1], [], []>, precision = #tpu.contract_precision<fp32>} : vector<1x50xf32>, vector<50x10xf32>, vector<1x10xf32> -> vector<1x10xf32>
    %c0_3 = arith.constant 0 : index
    %c0_4 = arith.constant 0 : index
    %3 = vector.load %arg2[%c0_3, %c0_4] : memref<1x10xf32, #tpu.memory_space<vmem>>, vector<1x10xf32>
    %4 = arith.addf %2, %3 : vector<1x10xf32>
    %c0_5 = arith.constant 0 : index
    %c0_6 = arith.constant 0 : index
    %5 = vector.load %arg3[%c0_5, %c0_6] : memref<1x10xf32, #tpu.memory_space<vmem>>, vector<1x10xf32>
    tpu.vector_store %arg3[%c0_5, %c0_6], %4 {strides = array<i32>} : memref<1x10xf32, #tpu.memory_space<vmem>>, vector<1x10xf32>,
    return
  }
}

</mosaic_0001>

<bundles_post_ra>
// kernel: linear_add.1
= control target key start
LH: loop header
LB: loop body
LE: loop exit
PB: predicated region body
PF: predicated region fallthrough
CT: control target
= control target key end

     0   :  { %v814_v3 = vmov 0.0|0.0   ;;  %vm815_vm0 = vmmov 0   ;;  %v816_v15 = vmov 0.0   ;;  %s975_s0 = inlined_call_operand.vmem [shape: f32[1,50], index: 0, kind: input, shape index: {}]   ;;  %s976_s1 = inlined_call_operand.vmem [shape: f32[50,10], index: 1, kind: input, shape index: {}]   ;;  %s977_s2 = inlined_call_operand.vmem [shape: f32[1,10], index: 2, kind: input, shape index: {}]   ;;  %s978_s3 = inlined_call_operand.hbm [shape: f32[1,10], index: 3, kind: output, shape index: {}]  }
   0x1   :  { %v16_v0 = vld [vmem:[%s976_s1] sm:$0xff]  ;;  %v17_v1 = vld [vmem:[%s976_s1 + $0x8] sm:$0xff]  ;;  %v18_v2 = vld [vmem:[%s976_s1 + $0x10] sm:$0xff]  ;;  %722 = vmatprep.subr.bf16.mxu1 %v814_v3  ;;  %749 = vmatprep.subr.bf16.mxu0 %v814_v3 }
   0x2   :  { %v33_v4 = vand.u32 4294901760, %v16_v0  ;;  %v36_v5 = vand.u32 4294901760, %v17_v1  ;;  %v19_v6 = vld [vmem:[%s976_s1 + $0x18] sm:$0xff]  ;;  %v39_v7 = vand.u32 4294901760, %v18_v2  ;;  %v20_v8 = vld [vmem:[%s976_s1 + $0x20] sm:$0xff]  ;;  %v21_v10 = vld [vmem:[%s976_s1 + $0x28] sm:$0xff]  ;;  %634 = vmatprep.mubr.msk.f32.mxu1 %vm815_vm0, %v816_v15 }
   0x3   :  { %v42_v9 = vand.u32 4294901760, %v19_v6  ;;  %v15_v16 = vld [vmem:[%s975_s0] sm:$0x1] }
   0x4   :  { %v858_v11 = vpack.c.bf16 %v36_v5, %v33_v4  ;;  %v860_v12 = vsub.f32 %v16_v0, %v33_v4  ;;  %v862_v13 = vsub.f32 %v17_v1, %v36_v5  ;;  %v864_v14 = vsub.f32 %v18_v2, %v39_v7 }
   0x5   :  { %8 = vsyncpa [#allocation3], 0  ;;  %v871_v17 = vsub.f32 %v19_v6, %v42_v9  ;;  %v45_v18 = vand.u32 4294901760, %v20_v8  ;;  %685 = vmatprep.mubr.msk.f32.mxu0 %vm815_vm0, %v816_v15  ;;  %v877_v19 = vpack.c.bf16 %v42_v9, %v39_v7  ;;  %v48_v20 = vand.u32 4294901760, %v21_v10  ;;  %v22_v25 = vld [vmem:[%s976_s1 + $0x30] sm:$0x3] }
   0x6   :  { %724 = vmatpush3.bf16.msra.mxu1 %v858_v11  ;;  %751 = vmatpush3.bf16.msra.mxu0 %v858_v11  ;;  %vm24_vm1 = vcmask 408576   ;;  %v117_v21 = vand.u32 4294901760, %v860_v12  ;;  %v124_v23 = vand.u32 4294901760, %v862_v13  ;;  %vm28_vm2 = vcmask 1041408   ;;  %v23_v0 = vld [vmem:[%s977_s2] sm:$0x1] }
   0x7   :  { %725 = vmatprep.subr.bf16.mxu1 %v814_v3  ;;  %752 = vmatprep.subr.bf16.mxu0 %v814_v3  ;;  %v26_v22 = vsel %vm24_vm1, %v15_v16, 0  ;;  %v883_v24 = vsub.f32 %v20_v8, %v45_v18  ;;  %v131_v27 = vand.u32 4294901760, %v864_v14  ;;  %v891_v28 = vsub.f32 %v21_v10, %v48_v20  ;;  %s817_s28 = smov [#allocation2]  }
   0x8   :  { %v888_v26 = vand.u32 4294901760, %v26_v22  ;;  %v118_v29 = vsub.f32 %v860_v12, %v117_v21  ;;  %v125_v30 = vsub.f32 %v862_v13, %v124_v23  ;;  %v138_v31 = vand.u32 4294901760, %v871_v17  ;;  %s564_s29 = sshll.u32 %s817_s28, 4  ;;  %s565_s29 = int_to_ptr.vmem [resolvable:$true] %s564_s29 }
   0x9   :  { %v898_v32 = vpack.c.bf16 %v48_v20, %v45_v18  ;;  %v30_v34 = vsel %vm28_vm2, %v22_v25, 0  ;;  %v132_v36 = vsub.f32 %v864_v14, %v131_v27  ;;  %v145_v37 = vand.u32 4294901760, %v883_v24  ;;  %s790_s30 = scalar_lea.vmem %s565_s29, 16  ;;  %s794_s4 = scalar_lea.vmem %s565_s29, 32 }
   0xa   :  { %727 = vmatpush3.bf16.msra.mxu1 %v877_v19  ;;  %754 = vmatpush3.bf16.msra.mxu0 %v877_v19  ;;  %v901_v33 = vsub.f32 %v26_v22, %v888_v26  ;;  %v119_v38 = vand.u32 4294901760, %v118_v29  ;;  %v126_v39 = vand.u32 4294901760, %v125_v30  ;;  %v139_v40 = vsub.f32 %v871_v17, %v138_v31  ;;  %p791_p0 = scmp.ne.s32.totalorder %s565_s29, %s790_s30  ;;  %p795_p1 = scmp.lt.s32.totalorder %s565_s29, %s565_s29 }
   0xb   :  { %728 = vmatprep.subr.bf16.mxu1 %v814_v3  ;;  %755 = vmatprep.subr.bf16.mxu0 %v814_v3  ;;  %v152_v41 = vand.u32 4294901760, %v891_v28  ;;  %v912_v42 = vand.u32 4294901760, %v30_v34  ;;  %v759_v46 = vpack.c.bf16 %v124_v23, %v117_v21  ;;  %v133_v47 = vand.u32 4294901760, %v132_v36  ;;  %p796_p2 = scmp.lt.s32.totalorder %s794_s4, %s790_s30 }
   0xc   :  { %v106_v35 = vand.u32 4294901760, %v901_v33  ;;  %v732_v48 = vpack.c.bf16 %v126_v39, %v119_v38  ;;  %v140_v49 = vand.u32 4294901760, %v139_v40  ;;  %v146_v50 = vsub.f32 %v883_v24, %v145_v37 }
   0xd   :  { %v158_v44 = vsub.f32 %v30_v34, %v912_v42  ;;  %v153_v51 = vsub.f32 %v891_v28, %v152_v41  ;;  %v762_v52 = vpack.c.bf16 %v138_v31, %v131_v27  ;;  %v765_v58 = vpack.c.bf16 %v152_v41, %v145_v37  ;;  %p797_p3 = por %p796_p2, %p795_p1 }
   0xe   :  { %730 = vmatpush3.bf16.msra.mxu1 %v898_v32  ;;  %757 = vmatpush3.bf16.msra.mxu0 %v898_v32  ;;  %v107_v43 = vsub.f32 %v901_v33, %v106_v35  ;;  %v735_v53 = vpack.c.bf16 %v140_v49, %v133_v47  ;;  %v147_v54 = vand.u32 4294901760, %v146_v50  ;;  %v741_v61 = vpack.c.bf16 %v862_v13, %v860_v12 }
   0xf   :  { %632 = vmatprep.subr.mxu1 %v816_v15  ;;  %683 = vmatprep.subr.mxu0 %v816_v15  ;;  %v154_v55 = vand.u32 4294901760, %v153_v51  ;;  %v159_v56 = vand.u32 4294901760, %v158_v44  ;;  %v744_v62 = vpack.c.bf16 %v871_v17, %v864_v14  ;;  %v747_v63 = vpack.c.bf16 %v891_v28, %v883_v24  ;;  %p798_p4 = pnand %p797_p3, %p791_p0 }
  0x10   :  { %v108_v45 = vand.u32 4294901760, %v107_v43  ;;  %vm556_vm3 = vcmask 73728  }
  0x11   :  { %v738_v57 = vpack.c.bf16 %v154_v55, %v147_v54  ;;  %v160_v59 = vsub.f32 %v158_v44, %v159_v56 }
  0x12   :  { %633 = vmatpush3.msra.mxu1 %v912_v42  ;;  %684 = vmatpush3.msra.mxu0 %v912_v42 }
  0x13   :  { %731 = vmatprep.subr.bf16.mxu1 %v814_v3  ;;  %758 = vmatprep.subr.bf16.mxu0 %v814_v3  ;;  %v161_v60 = vand.u32 4294901760, %v160_v59 }
  0x14   :  { %635 = vmatmul.mubr.f32.vlgmr.msra.gmra.mrb[0].mxu1 %v108_v45  ;;  %686 = vmatmul.mubr.f32.vlgmr.msra.gmra.mrb[0].mxu0 %v106_v35 }
  0x15   :  { %733 = vmatpush3.bf16.msra.mxu1 %v732_v48  ;;  %760 = vmatpush3.bf16.msra.mxu0 %v759_v46 }
  0x16   :  { %734 = vmatprep.subr.bf16.mxu1 %v814_v3  ;;  %761 = vmatprep.subr.bf16.mxu0 %v814_v3 }
  0x17   :  { %651 = vmatprep.mubr.msk.f32.mxu1 %vm815_vm0, %v816_v15  ;;  %702 = vmatprep.mubr.msk.f32.mxu0 %vm815_vm0, %v816_v15 }
  0x19   :  { %736 = vmatpush3.bf16.msra.mxu1 %v735_v53  ;;  %763 = vmatpush3.bf16.msra.mxu0 %v762_v52 }
  0x1a   :  { %737 = vmatprep.subr.bf16.mxu1 %v814_v3  ;;  %764 = vmatprep.subr.bf16.mxu0 %v814_v3 }
  0x1d   :  { %739 = vmatpush3.bf16.msra.mxu1 %v738_v57  ;;  %766 = vmatpush3.bf16.msra.mxu0 %v765_v58 }
  0x1e   :  { %649 = vmatprep.subr.mxu1 %v816_v15  ;;  %700 = vmatprep.subr.mxu0 %v816_v15 }
  0x21   :  { %650 = vmatpush3.msra.mxu1 %v161_v60  ;;  %701 = vmatpush3.msra.mxu0 %v159_v56 }
  0x22   :  { %740 = vmatprep.subr.bf16.mxu1 %v814_v3  ;;  %767 = vmatprep.subr.bf16.mxu0 %v814_v3 }
  0x23   :  { %652 = vmatmul.mubr.f32.vlgmr.msra.gmra.mrb[0].mxu1 %v888_v26  ;;  %703 = vmatmul.mubr.f32.vlgmr.msra.gmra.mrb[0].mxu0 %v888_v26 }
  0x24   :  { %742 = vmatpush3.bf16.msra.mxu1 %v741_v61  ;;  %769 = vmatpush3.bf16.msra.mxu0 %v858_v11 }
  0x25   :  { %743 = vmatprep.subr.bf16.mxu1 %v814_v3  ;;  %770 = vmatprep.subr.bf16.mxu0 %v814_v3 }
  0x26   :  { %668 = vmatprep.mubr.msk.f32.mxu1 %vm815_vm0, %v816_v15  ;;  %719 = vmatprep.mubr.msk.f32.mxu0 %vm815_vm0, %v816_v15 }
  0x28   :  { %745 = vmatpush3.bf16.msra.mxu1 %v744_v62  ;;  %772 = vmatpush3.bf16.msra.mxu0 %v877_v19 }
  0x29   :  { %746 = vmatprep.subr.bf16.mxu1 %v814_v3  ;;  %773 = vmatprep.subr.bf16.mxu0 %v814_v3 }
  0x2c   :  { %748 = vmatpush3.bf16.msra.mxu1 %v747_v63  ;;  %775 = vmatpush3.bf16.msra.mxu0 %v898_v32 }
  0x2d   :  { %666 = vmatprep.subr.mxu1 %v816_v15  ;;  %717 = vmatprep.subr.mxu0 %v816_v15 }
  0x30   :  { %667 = vmatpush3.msra.mxu1 %v158_v44  ;;  %718 = vmatpush3.msra.mxu0 %v912_v42 }
  0x31   :  { %669 = vmatmul.mubr.f32.vlgmr.msra.gmra.mrb[0].mxu1 %v901_v33  ;;  %720 = vmatmul.mubr.f32.vlgmr.msra.gmra.mrb[0].mxu0 %v888_v26 }
 0x104   :  { %v302_v1 = vpop.f32.mrb[0].mxu1  ;;  %v552_v2 = vpop.f32.mrb[0].mxu0 }
 0x105   :  { %v776_v3 = vadd.f32 %v302_v1, %v23_v0  ;;  %v670_v4 = vpop.f32.mrb[1].mxu1  ;;  %v721_v5 = vpop.f32.mrb[1].mxu0 }
 0x107   :  { %v777_v6 = vadd.f32 %v776_v3, %v552_v2 }
 0x109   :  { %557 = vst.msk [vmem:[#allocation2] sm:$0x1] %vm556_vm3, %v777_v6 }
 0x10a   :  { %801 = shalt.err (!%p798_p4)
}
 0x10b   :  { %s802_s6 = scalar_lea.hbm %s978_s3, 16 }
 0x10c   :  { %p803_p5 = scmp.ne.s32.totalorder %s978_s3, %s802_s6  ;;  %p806_p6 = scmp.lt.u32.totalorder %s802_s6, %s978_s3 }
 0x10e   :  { %p808_p7 = pnand %p806_p6, %p803_p5 }
 0x110   :  { %811 = shalt.err (!%p808_p7)
}
 0x111   :  { %567 = dma.vmem_to_hbm [thread:$0]  %s565_s29, 16, %s978_s3, [#allocation3]  }
 0x112   :  { %812 = dma.done.wait [#allocation3], 16  }
 0x113   :  { %813 = vsyncadd [#allocation3], 4294967280 }
 0x114   :  { %571 = vsyncpa [#allocation3], 1 }

</bundles_post_ra>
